<compile_context>
chip_gen: v7x
topology: tpu7x:2x2x1
jax: 0.10.0
libtpu: 0.0.40
codegen_flags: <defaults>
</compile_context>

<pallas_src>
import jax
import jax.numpy as jnp
from jax import lax
from jax.experimental import pallas as pl
from jax.experimental.pallas import tpu as pltpu


def w2v_kernel(idx_ref, emb_ref, w_ref, bias_ref, out_ref):
    # idx_ref  : SMEM (B, C) int32   -- scalar-prefetched context word indices
    # emb_ref  : VMEM (V, D) f32     -- full embedding table (resident across grid steps)
    # w_ref    : VMEM (TN, D) bf16   -- tile of nn.Linear weight, torch (out, in) layout
    # bias_ref : VMEM (1, TN) f32    -- tile of bias
    # out_ref  : VMEM (B, TN) f32    -- tile of logits
    B, C = idx_ref.shape
    V, D = emb_ref.shape
    inv_c = 1.0 / C

    # Gather + mean over the context window. B is tiny & static; the inner
    # context loop is unrolled so the scheduler can overlap the SMEM index
    # reads with the VMEM row loads. Indices are clamped (no runtime bounds
    # check on VMEM refs).
    rows = []
    for b in range(B):
        def body(c, acc, _b=b):
            idx = jnp.clip(idx_ref[_b, c], 0, V - 1)
            return acc + emb_ref[pl.ds(idx, 1), :]          # (1, D) f32

        acc = lax.fori_loop(0, C, body, jnp.zeros((1, D), jnp.float32), unroll=True)
        rows.append(acc)
    proj = jnp.concatenate(rows, axis=0) * inv_c            # (B, D) f32

    # Projection: (B, D) x (TN, D) contracting over D -> (B, TN); bf16 inputs,
    # f32 accumulation on the MXU. Bias broadcasts over the batch axis.
    out_ref[...] = (
        lax.dot_general(
            proj.astype(jnp.bfloat16),
            w_ref[...],
            dimension_numbers=(((1,), (1,)), ((), ())),
            preferred_element_type=jnp.float32,
        )
        + bias_ref[...]
    )


def word2vec_forward(x, emb, weight, bias, *, block_v=None):
    """Forward pass matching torch Word2Vec.

    x      : (B, C) int   -- context word indices
    emb    : (V, D) f32   -- nn.Embedding weight
    weight : (V, D) f32   -- nn.Linear weight (out_features, in_features), NOT transposed
    bias   : (V,)   f32   -- nn.Linear bias
    returns (B, V) f32 logits
    """
    B, C = x.shape
    V, D = emb.shape
    assert weight.shape == (V, D) and bias.shape == (V,)

    if block_v is None:
        # Lane-dense vocab tiles (multiple of 128) when possible; otherwise the
        # full vocab dim (always a legal block).
        block_v = min(512, V) if V % 128 == 0 else V
    grid = (pl.cdiv(V, block_v),)

    emb_f32 = emb.astype(jnp.float32)
    w_bf16 = weight.astype(jnp.bfloat16)          # torch layout kept -> no glue transpose
    bias2d = bias.astype(jnp.float32).reshape(1, V)

    grid_spec = pltpu.PrefetchScalarGridSpec(
        num_scalar_prefetch=1,                    # x lands in SMEM before the grid runs
        grid=grid,
        in_specs=[
            pl.BlockSpec(memory_space=pltpu.MemorySpace.VMEM),     # emb: whole table, resident
            pl.BlockSpec((block_v, D), lambda j, idx: (j, 0)),     # weight tile over V
            pl.BlockSpec((1, block_v), lambda j, idx: (0, j)),     # bias tile over V
        ],
        out_specs=pl.BlockSpec((B, block_v), lambda j, idx: (0, j)),
    )

    return pl.pallas_call(
        w2v_kernel,
        out_shape=jax.ShapeDtypeStruct((B, V), jnp.float32),
        grid_spec=grid_spec,
        compiler_params=pltpu.CompilerParams(
            dimension_semantics=("parallel",),     # independent vocab tiles -> megacore on v7x
            vmem_limit_bytes=32 * 1024 * 1024,     # portable tile plan on v5e's 16 MiB default
        ),
    )(x.astype(jnp.int32), emb_f32, w_bf16, bias2d)


def word2vec_ref(x, emb, weight, bias):
    # Reference with the same bf16-rounded projection weight the kernel streams.
    w = weight.astype(jnp.bfloat16).astype(jnp.float32)
    proj = jnp.take(emb, x, axis=0).mean(axis=1)           # (B, D)
    return proj @ w.T + bias                               # (B, V)


if __name__ == "__main__":
    # Small synthetic shapes consistent with the module.
    word_count = 256
    embedding_dim = 32
    batch = 2
    context = 8

    key = jax.random.PRNGKey(0)
    k_emb, k_w, k_b, k_x = jax.random.split(key, 4)

    emb = jax.random.normal(k_emb, (word_count, embedding_dim), dtype=jnp.float32)
    bound = 1.0 / (embedding_dim ** 0.5)
    weight = jax.random.uniform(
        k_w, (word_count, embedding_dim), minval=-bound, maxval=bound, dtype=jnp.float32
    )
    bias = jax.random.uniform(
        k_b, (word_count,), minval=-bound, maxval=bound, dtype=jnp.float32
    )
    x = jax.random.randint(k_x, (batch, context), 0, word_count, dtype=jnp.int32)

    # block_v=128 -> grid of 2 vocab tiles, exercising the pipelined weight stream.
    out = word2vec_forward(x, emb, weight, bias, block_v=128)
    out = jax.block_until_ready(out)

    ref = word2vec_ref(x, emb, weight, bias)
    assert out.shape == (batch, word_count)
    assert jnp.allclose(out, ref, atol=1e-2, rtol=1e-2), "mismatch vs pure-JAX reference"

    print("KERNEL_OK")
</pallas_src>

<mosaic_0001>
module attributes {stable_mosaic.version = 11 : i64} {
  func.func @w2v_kernel(%arg0: i32, %arg1: memref<2x8xi32, #tpu.memory_space<smem>>, %arg2: memref<256x32xf32, #tpu.memory_space<vmem>>, %arg3: memref<128x32xbf16, #tpu.memory_space<vmem>>, %arg4: memref<1x128xf32, #tpu.memory_space<vmem>>, %arg5: memref<2x128xf32, #tpu.memory_space<vmem>>) attributes {dimension_semantics = [#tpu.dimension_semantics<parallel>], iteration_bounds = array<i64: 2>, scalar_prefetch = 1 : i64, scratch_operands = 0 : i64, tpu.core_type = #tpu.core_type<tc>, window_params = [{pipeline_mode = #tpu.pipeline_mode<synchronous>, transform_indices = @transform_0, window_bounds = array<i64: 256, 32>}, {transform_indices = @transform_1, window_bounds = array<i64: 128, 32>}, {transform_indices = @transform_2, window_bounds = array<i64: 1, 128>}, {transform_indices = @transform_3, window_bounds = array<i64: 2, 128>}]} {
    %cst = arith.constant 0.000000e+00 : f32
    %0 = vector.broadcast %cst : f32 to vector<1x32xf32>
    %c0_i32 = arith.constant 0 : i32
    %c0 = arith.constant 0 : index
    %1 = arith.index_cast %c0_i32 : i32 to index
    %2 = memref.load %arg1[%c0, %1] : memref<2x8xi32, #tpu.memory_space<smem>>
    %c0_i32_0 = arith.constant 0 : i32
    %c255_i32 = arith.constant 255 : i32
    %3 = arith.maxsi %c0_i32_0, %2 : i32
    %4 = arith.minsi %c255_i32, %3 : i32
    %5 = arith.index_cast %4 : i32 to index
    %c0_1 = arith.constant 0 : index
    %6 = vector.load %arg2[%5, %c0_1] : memref<256x32xf32, #tpu.memory_space<vmem>>, vector<1x32xf32>
    %7 = arith.addf %0, %6 : vector<1x32xf32>
    %c1_i32 = arith.constant 1 : i32
    %c0_2 = arith.constant 0 : index
    %8 = arith.index_cast %c1_i32 : i32 to index
    %9 = memref.load %arg1[%c0_2, %8] : memref<2x8xi32, #tpu.memory_space<smem>>
    %c0_i32_3 = arith.constant 0 : i32
    %c255_i32_4 = arith.constant 255 : i32
    %10 = arith.maxsi %c0_i32_3, %9 : i32
    %11 = arith.minsi %c255_i32_4, %10 : i32
    %12 = arith.index_cast %11 : i32 to index
    %c0_5 = arith.constant 0 : index
    %13 = vector.load %arg2[%12, %c0_5] : memref<256x32xf32, #tpu.memory_space<vmem>>, vector<1x32xf32>
    %14 = arith.addf %7, %13 : vector<1x32xf32>
    %c2_i32 = arith.constant 2 : i32
    %c0_6 = arith.constant 0 : index
    %15 = arith.index_cast %c2_i32 : i32 to index
    %16 = memref.load %arg1[%c0_6, %15] : memref<2x8xi32, #tpu.memory_space<smem>>
    %c0_i32_7 = arith.constant 0 : i32
    %c255_i32_8 = arith.constant 255 : i32
    %17 = arith.maxsi %c0_i32_7, %16 : i32
    %18 = arith.minsi %c255_i32_8, %17 : i32
    %19 = arith.index_cast %18 : i32 to index
    %c0_9 = arith.constant 0 : index
    %20 = vector.load %arg2[%19, %c0_9] : memref<256x32xf32, #tpu.memory_space<vmem>>, vector<1x32xf32>
    %21 = arith.addf %14, %20 : vector<1x32xf32>
    %c3_i32 = arith.constant 3 : i32
    %c0_10 = arith.constant 0 : index
    %22 = arith.index_cast %c3_i32 : i32 to index
    %23 = memref.load %arg1[%c0_10, %22] : memref<2x8xi32, #tpu.memory_space<smem>>
    %c0_i32_11 = arith.constant 0 : i32
    %c255_i32_12 = arith.constant 255 : i32
    %24 = arith.maxsi %c0_i32_11, %23 : i32
    %25 = arith.minsi %c255_i32_12, %24 : i32
    %26 = arith.index_cast %25 : i32 to index
    %c0_13 = arith.constant 0 : index
    %27 = vector.load %arg2[%26, %c0_13] : memref<256x32xf32, #tpu.memory_space<vmem>>, vector<1x32xf32>
    %28 = arith.addf %21, %27 : vector<1x32xf32>
    %c4_i32 = arith.constant 4 : i32
    %c0_14 = arith.constant 0 : index
    %29 = arith.index_cast %c4_i32 : i32 to index
    %30 = memref.load %arg1[%c0_14, %29] : memref<2x8xi32, #tpu.memory_space<smem>>
    %c0_i32_15 = arith.constant 0 : i32
    %c255_i32_16 = arith.constant 255 : i32
    %31 = arith.maxsi %c0_i32_15, %30 : i32
    %32 = arith.minsi %c255_i32_16, %31 : i32
    %33 = arith.index_cast %32 : i32 to index
    %c0_17 = arith.constant 0 : index
    %34 = vector.load %arg2[%33, %c0_17] : memref<256x32xf32, #tpu.memory_space<vmem>>, vector<1x32xf32>
    %35 = arith.addf %28, %34 : vector<1x32xf32>
    %c5_i32 = arith.constant 5 : i32
    %c0_18 = arith.constant 0 : index
    %36 = arith.index_cast %c5_i32 : i32 to index
    %37 = memref.load %arg1[%c0_18, %36] : memref<2x8xi32, #tpu.memory_space<smem>>
    %c0_i32_19 = arith.constant 0 : i32
    %c255_i32_20 = arith.constant 255 : i32
    %38 = arith.maxsi %c0_i32_19, %37 : i32
    %39 = arith.minsi %c255_i32_20, %38 : i32
    %40 = arith.index_cast %39 : i32 to index
    %c0_21 = arith.constant 0 : index
    %41 = vector.load %arg2[%40, %c0_21] : memref<256x32xf32, #tpu.memory_space<vmem>>, vector<1x32xf32>
    %42 = arith.addf %35, %41 : vector<1x32xf32>
    %c6_i32 = arith.constant 6 : i32
    %c0_22 = arith.constant 0 : index
    %43 = arith.index_cast %c6_i32 : i32 to index
    %44 = memref.load %arg1[%c0_22, %43] : memref<2x8xi32, #tpu.memory_space<smem>>
    %c0_i32_23 = arith.constant 0 : i32
    %c255_i32_24 = arith.constant 255 : i32
    %45 = arith.maxsi %c0_i32_23, %44 : i32
    %46 = arith.minsi %c255_i32_24, %45 : i32
    %47 = arith.index_cast %46 : i32 to index
    %c0_25 = arith.constant 0 : index
    %48 = vector.load %arg2[%47, %c0_25] : memref<256x32xf32, #tpu.memory_space<vmem>>, vector<1x32xf32>
    %49 = arith.addf %42, %48 : vector<1x32xf32>
    %c7_i32 = arith.constant 7 : i32
    %c0_26 = arith.constant 0 : index
    %50 = arith.index_cast %c7_i32 : i32 to index
    %51 = memref.load %arg1[%c0_26, %50] : memref<2x8xi32, #tpu.memory_space<smem>>
    %c0_i32_27 = arith.constant 0 : i32
    %c255_i32_28 = arith.constant 255 : i32
    %52 = arith.maxsi %c0_i32_27, %51 : i32
    %53 = arith.minsi %c255_i32_28, %52 : i32
    %54 = arith.index_cast %53 : i32 to index
    %c0_29 = arith.constant 0 : index
    %55 = vector.load %arg2[%54, %c0_29] : memref<256x32xf32, #tpu.memory_space<vmem>>, vector<1x32xf32>
    %56 = arith.addf %49, %55 : vector<1x32xf32>
    %c8_i32 = arith.constant 8 : i32
    %cst_30 = arith.constant 0.000000e+00 : f32
    %57 = vector.broadcast %cst_30 : f32 to vector<1x32xf32>
    %c0_i32_31 = arith.constant 0 : i32
    %c1 = arith.constant 1 : index
    %58 = arith.index_cast %c0_i32_31 : i32 to index
    %59 = memref.load %arg1[%c1, %58] : memref<2x8xi32, #tpu.memory_space<smem>>
    %c0_i32_32 = arith.constant 0 : i32
    %c255_i32_33 = arith.constant 255 : i32
    %60 = arith.maxsi %c0_i32_32, %59 : i32
    %61 = arith.minsi %c255_i32_33, %60 : i32
    %62 = arith.index_cast %61 : i32 to index
    %c0_34 = arith.constant 0 : index
    %63 = vector.load %arg2[%62, %c0_34] : memref<256x32xf32, #tpu.memory_space<vmem>>, vector<1x32xf32>
    %64 = arith.addf %57, %63 : vector<1x32xf32>
    %c1_i32_35 = arith.constant 1 : i32
    %c1_36 = arith.constant 1 : index
    %65 = arith.index_cast %c1_i32_35 : i32 to index
    %66 = memref.load %arg1[%c1_36, %65] : memref<2x8xi32, #tpu.memory_space<smem>>
    %c0_i32_37 = arith.constant 0 : i32
    %c255_i32_38 = arith.constant 255 : i32
    %67 = arith.maxsi %c0_i32_37, %66 : i32
    %68 = arith.minsi %c255_i32_38, %67 : i32
    %69 = arith.index_cast %68 : i32 to index
    %c0_39 = arith.constant 0 : index
    %70 = vector.load %arg2[%69, %c0_39] : memref<256x32xf32, #tpu.memory_space<vmem>>, vector<1x32xf32>
    %71 = arith.addf %64, %70 : vector<1x32xf32>
    %c2_i32_40 = arith.constant 2 : i32
    %c1_41 = arith.constant 1 : index
    %72 = arith.index_cast %c2_i32_40 : i32 to index
    %73 = memref.load %arg1[%c1_41, %72] : memref<2x8xi32, #tpu.memory_space<smem>>
    %c0_i32_42 = arith.constant 0 : i32
    %c255_i32_43 = arith.constant 255 : i32
    %74 = arith.maxsi %c0_i32_42, %73 : i32
    %75 = arith.minsi %c255_i32_43, %74 : i32
    %76 = arith.index_cast %75 : i32 to index
    %c0_44 = arith.constant 0 : index
    %77 = vector.load %arg2[%76, %c0_44] : memref<256x32xf32, #tpu.memory_space<vmem>>, vector<1x32xf32>
    %78 = arith.addf %71, %77 : vector<1x32xf32>
    %c3_i32_45 = arith.constant 3 : i32
    %c1_46 = arith.constant 1 : index
    %79 = arith.index_cast %c3_i32_45 : i32 to index
    %80 = memref.load %arg1[%c1_46, %79] : memref<2x8xi32, #tpu.memory_space<smem>>
    %c0_i32_47 = arith.constant 0 : i32
    %c255_i32_48 = arith.constant 255 : i32
    %81 = arith.maxsi %c0_i32_47, %80 : i32
    %82 = arith.minsi %c255_i32_48, %81 : i32
    %83 = arith.index_cast %82 : i32 to index
    %c0_49 = arith.constant 0 : index
    %84 = vector.load %arg2[%83, %c0_49] : memref<256x32xf32, #tpu.memory_space<vmem>>, vector<1x32xf32>
    %85 = arith.addf %78, %84 : vector<1x32xf32>
    %c4_i32_50 = arith.constant 4 : i32
    %c1_51 = arith.constant 1 : index
    %86 = arith.index_cast %c4_i32_50 : i32 to index
    %87 = memref.load %arg1[%c1_51, %86] : memref<2x8xi32, #tpu.memory_space<smem>>
    %c0_i32_52 = arith.constant 0 : i32
    %c255_i32_53 = arith.constant 255 : i32
    %88 = arith.maxsi %c0_i32_52, %87 : i32
    %89 = arith.minsi %c255_i32_53, %88 : i32
    %90 = arith.index_cast %89 : i32 to index
    %c0_54 = arith.constant 0 : index
    %91 = vector.load %arg2[%90, %c0_54] : memref<256x32xf32, #tpu.memory_space<vmem>>, vector<1x32xf32>
    %92 = arith.addf %85, %91 : vector<1x32xf32>
    %c5_i32_55 = arith.constant 5 : i32
    %c1_56 = arith.constant 1 : index
    %93 = arith.index_cast %c5_i32_55 : i32 to index
    %94 = memref.load %arg1[%c1_56, %93] : memref<2x8xi32, #tpu.memory_space<smem>>
    %c0_i32_57 = arith.constant 0 : i32
    %c255_i32_58 = arith.constant 255 : i32
    %95 = arith.maxsi %c0_i32_57, %94 : i32
    %96 = arith.minsi %c255_i32_58, %95 : i32
    %97 = arith.index_cast %96 : i32 to index
    %c0_59 = arith.constant 0 : index
    %98 = vector.load %arg2[%97, %c0_59] : memref<256x32xf32, #tpu.memory_space<vmem>>, vector<1x32xf32>
    %99 = arith.addf %92, %98 : vector<1x32xf32>
    %c6_i32_60 = arith.constant 6 : i32
    %c1_61 = arith.constant 1 : index
    %100 = arith.index_cast %c6_i32_60 : i32 to index
    %101 = memref.load %arg1[%c1_61, %100] : memref<2x8xi32, #tpu.memory_space<smem>>
    %c0_i32_62 = arith.constant 0 : i32
    %c255_i32_63 = arith.constant 255 : i32
    %102 = arith.maxsi %c0_i32_62, %101 : i32
    %103 = arith.minsi %c255_i32_63, %102 : i32
    %104 = arith.index_cast %103 : i32 to index
    %c0_64 = arith.constant 0 : index
    %105 = vector.load %arg2[%104, %c0_64] : memref<256x32xf32, #tpu.memory_space<vmem>>, vector<1x32xf32>
    %106 = arith.addf %99, %105 : vector<1x32xf32>
    %c7_i32_65 = arith.constant 7 : i32
    %c1_66 = arith.constant 1 : index
    %107 = arith.index_cast %c7_i32_65 : i32 to index
    %108 = memref.load %arg1[%c1_66, %107] : memref<2x8xi32, #tpu.memory_space<smem>>
    %c0_i32_67 = arith.constant 0 : i32
    %c255_i32_68 = arith.constant 255 : i32
    %109 = arith.maxsi %c0_i32_67, %108 : i32
    %110 = arith.minsi %c255_i32_68, %109 : i32
    %111 = arith.index_cast %110 : i32 to index
    %c0_69 = arith.constant 0 : index
    %112 = vector.load %arg2[%111, %c0_69] : memref<256x32xf32, #tpu.memory_space<vmem>>, vector<1x32xf32>
    %113 = arith.addf %106, %112 : vector<1x32xf32>
    %c8_i32_70 = arith.constant 8 : i32
    %114 = tpu.concatenate %56, %113 in 0 : vector<1x32xf32>, vector<1x32xf32> -> vector<2x32xf32>
    %cst_71 = arith.constant 1.250000e-01 : f32
    %115 = vector.broadcast %cst_71 : f32 to vector<2x32xf32>
    %116 = arith.mulf %114, %115 : vector<2x32xf32>
    %117 = arith.truncf %116 : vector<2x32xf32> to vector<2x32xbf16>
    %c0_72 = arith.constant 0 : index
    %c0_73 = arith.constant 0 : index
    %118 = vector.load %arg3[%c0_72, %c0_73] : memref<128x32xbf16, #tpu.memory_space<vmem>>, vector<128x32xbf16>
    %cst_74 = arith.constant dense<0.000000e+00> : vector<2x128xf32>
    %119 = tpu.matmul %117, %118, %cst_74 {dimension_numbers = #tpu.dot_dimension_numbers<[1], [1], [0], [0], [0, 0, 1, 0], [], []>} : vector<2x32xbf16>, vector<128x32xbf16>, vector<2x128xf32> -> vector<2x128xf32>
    %c0_75 = arith.constant 0 : index
    %c0_76 = arith.constant 0 : index
    %120 = vector.load %arg4[%c0_75, %c0_76] : memref<1x128xf32, #tpu.memory_space<vmem>>, vector<1x128xf32>
    %121 = vector.broadcast %120 : vector<1x128xf32> to vector<2x128xf32>
    %122 = arith.addf %119, %121 : vector<2x128xf32>
    %c0_77 = arith.constant 0 : index
    %c0_78 = arith.constant 0 : index
    %123 = vector.load %arg5[%c0_77, %c0_78] : memref<2x128xf32, #tpu.memory_space<vmem>>, vector<2x128xf32>
    tpu.vector_store %arg5[%c0_77, %c0_78], %122 {strides = array<i32>} : memref<2x128xf32, #tpu.memory_space<vmem>>, vector<2x128xf32>,
    return
  }
  func.func @transform_0(%arg0: i32, %arg1: memref<2x8xi32, #tpu.memory_space<smem>>) -> (i32, i32) {
    %c0_i32 = arith.constant 0 : i32
    %c0_i32_0 = arith.constant 0 : i32
    %c0_i32_1 = arith.constant 0 : i32
    return %c0_i32, %c0_i32_0 : i32, i32
  }
  func.func @transform_1(%arg0: i32, %arg1: memref<2x8xi32, #tpu.memory_space<smem>>) -> (i32, i32) {
    %c0_i32 = arith.constant 0 : i32
    %c0_i32_0 = arith.constant 0 : i32
    return %arg0, %c0_i32 : i32, i32
  }
  func.func @transform_2(%arg0: i32, %arg1: memref<2x8xi32, #tpu.memory_space<smem>>) -> (i32, i32) {
    %c0_i32 = arith.constant 0 : i32
    %c0_i32_0 = arith.constant 0 : i32
    return %c0_i32, %arg0 : i32, i32
  }
  func.func @transform_3(%arg0: i32, %arg1: memref<2x8xi32, #tpu.memory_space<smem>>) -> (i32, i32) {
    %c0_i32 = arith.constant 0 : i32
    %c0_i32_0 = arith.constant 0 : i32
    return %c0_i32, %arg0 : i32, i32
  }
}

</mosaic_0001>

<bundles_post_ra>
// kernel: tpu_custom_call.1
= control target key start
LH: loop header
LB: loop body
LE: loop exit
PB: predicated region body
PF: predicated region fallthrough
CT: control target
= control target key end

     0   :  { %s1199_s0 = inlined_call_operand.vmem [shape: s32[2,8], index: 0, kind: input, shape index: {}]   ;;  %s1200_s1 = inlined_call_operand.vmem [shape: f32[256,32], index: 1, kind: input, shape index: {}]   ;;  %s1201_s2 = inlined_call_operand.vmem [shape: bf16[256,32], index: 2, kind: input, shape index: {}]   ;;  %s1202_s3 = inlined_call_operand.vmem [shape: f32[1,256], index: 3, kind: input, shape index: {}]   ;;  %s1203_s4 = inlined_call_operand.hbm [shape: f32[2,256], index: 4, kind: output, shape index: {}]  }
   0x1   :  { %1213 = sst [smem:[#allocation15_spill]] %s1201_s2  ;;  %s9_s17 = sshll.u32 %s1199_s0, 4  ;;  %s10_s17 = int_to_ptr.vmem [resolvable:$true] %s9_s17 }
   0x2   :  { %1214 = sst [smem:[#allocation16_spill]] %s1202_s3  ;;  %s785_s18 = scalar_lea.vmem %s10_s17, 32 }
   0x3   :  { %1215 = sst [smem:[#allocation17_spill]] %s1203_s4  ;;  %p786_p0 = scmp.ne.s32.totalorder %s10_s17, %s785_s18 }
   0x4   :  { %p790_p1 = scmp.lt.s32.totalorder %s10_s17, %s10_s17  ;;  %p791_p2 = scmp.lt.s32.totalorder %s785_s18, %s785_s18 }
   0x6   :  { %p792_p3 = por %p791_p2, %p790_p1 }
   0x8   :  { %p793_p4 = pnand %p792_p3, %p786_p0 }
   0xa   :  { %796 = shalt.err (!%p793_p4)  }
   0xb   :  { %s863_s19 = smov [#allocation3]  }
   0xc   :  { %12 = dma.vmem_to_smem %s10_s17, 32, %s863_s19, [#allocation2] }
   0xd   :  { %841 = dma.done.wait [#allocation2], 32 }
   0xe   :  { %842 = vsyncadd [#allocation2], 4294967264 }
   0xf   :  { %14 = sfence }
  0x10   :  { %15 = vsyncpa [#allocation5], 0 }
  0x11   :  { %17 = vsyncpa [#allocation5 + $0x1], 0  ;;  %s895_s20 = smov 0   ;;  %s897_s21 = smov 0  }
  0x12   :  { %s899_s0 = smov 0   ;;  %s901_s22 = smov 0  }
  0x13 LB: > { %1216 = sst [smem:[#allocation8_spill]] %s849_s20  ;;  %s916_s23 = sadd.s32 4294967295, %s861_s22   ;;  %s861_s22 = sphi %s901_s22, %s1239_s22   ;;  %s857_s0 = sphi %s899_s0, %s1241_s0   ;;  %s853_s21 = sphi %s897_s21, %s1243_s21   ;;  %s849_s20 = sphi %s895_s20, %s1242_s20  }
  0x14   : > { %1217 = sst [smem:[#allocation9_spill]] %s857_s0  ;;  %s558_s24 = sadd.s32 4294967294, %s861_s22  }
  0x15   : > { %1218 = sst [smem:[#allocation10_spill]] %s861_s22  ;;  %s920_s25 = sadd.s32 1, %s861_s22  }
  0x16   : > { %1219 = sst [smem:[#allocation11_spill]] %s920_s25  ;;  %s103_s26 = sadd.s32 1, %s857_s0 }
  0x17   : > { %s100_s27 = ssub.s32 %s861_s22, %s920_s25  ;;  %p113_p5 = scmp.ne.s32.totalorder %s857_s0, %s853_s21 }
  0x18   : > { %p101_p6 = scmp.eq.s32.totalorder %s100_s27, 0  ;;  %p114_p7 = scmp.eq.s32.totalorder %s916_s23, 1 }
  0x19   : > { %p119_p8 = scmp.ne.s32.totalorder %s853_s21, %s849_s20  ;;  %p120_p9 = scmp.eq.s32.totalorder %s558_s24, 1 }
  0x1a   : > { %s931_s28 = scalar_select %p101_p6, %s857_s0, %s103_s26  }
  0x1b   : > { %p933_p10 = por %p114_p7, %p113_p5  ;;  %p937_p11 = por %p120_p9, %p119_p8 }
  0x1c   : > { %1220 = sst [smem:[#allocation12_spill]] %s931_s28  ;;  %p561_p12 = scmp.ge.s32.totalorder %s861_s22, 1 }
  0x1d   : > { %s1221_s29 = scalar_select %p933_p10, 1, 0 }
  0x1e   : > { %s1223_s30 = scalar_select %p937_p11, 1, 0 }
  0x1f   : > { %1222 = sst [smem:[#allocation13_spill]] %s1221_s29  ;;  %p156_p13 = scmp.lt.s32.totalorder %s861_s22, 3 }
  0x20   : > { %1224 = sst [smem:[#allocation14_spill]] %s1223_s30 }
  0x21   : > { %p157_p0 = pnand %p561_p12, %p156_p13 }
  0x22   : > { %s563_s5 = sshll.u32 (!%p157_p0), %s916_s23, 4  ;;  %s193_s6 = sld [smem:[#allocation3]] (!%p157_p0)  ;;  %v864_v0 = vmov (!%p157_p0), 0.0   ;;  %vm865_vm0 = vmmov (!%p157_p0), 0   ;;  %vm391_vm1 = vcmask (!%p157_p0), 261120   ;;  %vm324_vm2 = vcmask (!%p157_p0), 1040384  }
  0x23   : > { %160 = sbr.rel (%p157_p0) target bundleno = 338 (0x152), region = 32  ;;  %715 = vmatprep.subr.bf16.mxu0 (!%p157_p0), %v864_v0  ;;  %p184_p1 = scmp.lt.s32.totalorder (!%p157_p0), %s563_s5, 31  ;;  %731 = vmatprep.mubr.msk.bf16.mxu0 (!%p157_p0), %vm865_vm0, %v864_v0 }
  0x24   : > { %s570_s8 = sld [smem:[#allocation3 + $0x1]] (!%p157_p0)  ;;  %s1225_s2 = sld [smem:[#allocation15_spill]] (!%p157_p0) }
  0x25   : > { %s951_s12 = sld [smem:[#allocation3 + $0x2]] (!%p157_p0)  ;;  %s954_s13 = sld [smem:[#allocation3 + $0x3]] (!%p157_p0) }
  0x26   : > { %s959_s14 = sld [smem:[#allocation3 + $0x4]] (!%p157_p0)  ;;  %s961_s15 = sld [smem:[#allocation3 + $0x5]] (!%p157_p0) }
  0x27   : > { %s963_s16 = sld [smem:[#allocation3 + $0x6]] (!%p157_p0)  ;;  %s606_s10 = sld [smem:[#allocation3 + $0x7]] (!%p157_p0) }
  0x28   : > { %p194_p2 = scmp.gt.s32.totalorder (!%p157_p0), %s193_s6, 0  ;;  %p565_p3 = scmp.lt.s32.totalorder (!%p157_p0), %s193_s6, 255 }
  0x29   : > { %s1027_s27 = sld [smem:[#allocation3 + $0x81]] (!%p157_p0)  ;;  %s1036_s28 = sld [smem:[#allocation3 + $0x83]] (!%p157_p0) }
  0x2a   : > { %s1245_s5 = smov (!%p184_p1, %s563_s5), 31  ;;  %s1247_s6 = smov (!%p194_p2, %s193_s6), 0 }
  0x2b   : > { %s564_s7 = sshll.u32 %s1245_s5, 2  ;;  %s1249_s6 = smov (!%p565_p3, %s1247_s6), 255 }
  0x2c   : > { %s949_s11 = scalar_lea.vmem %s1225_s2, %s564_s7  ;;  %p202_p4 = scmp.gt.s32.totalorder %s570_s8, 0 }
  0x2d   : > { %v777_v1 = vld [vmem:[%s949_s11] sm:$0xff]   ;;  %v778_v3 = vld [vmem:[%s949_s11 + $0x8] sm:$0xff]   ;;  %p571_p5 = scmp.lt.s32.totalorder %s570_s8, 255  ;;  %p210_p6 = scmp.gt.s32.totalorder %s951_s12, 0  ;;  %v779_v5 = vld [vmem:[%s949_s11 + $0x10] sm:$0xff]  }
  0x2e   : > { %v396_v2 = vsel %vm391_vm1, %v777_v1, 0  ;;  %v399_v4 = vsel %vm391_vm1, %v778_v3, 0  ;;  %s1251_s8 = smov (!%p202_p4, %s570_s8), 0  ;;  %p577_p7 = scmp.lt.s32.totalorder %s951_s12, 255  ;;  %v402_v6 = vsel %vm391_vm1, %v779_v5, 0  ;;  %v780_v7 = vld [vmem:[%s949_s11 + $0x18] sm:$0xff]  }
  0x2f   : > { %716 = vmatpush3.bf16.xpose.msra.mxu0 %v396_v2  ;;  %s211_s24 = scalar_select %p210_p6, %s951_s12, 0  ;;  %v405_v8 = vsel %vm391_vm1, %v780_v7, 0  ;;  %v781_v9 = vld [vmem:[%s949_s11 + $0x20] sm:$0xff]   ;;  %v782_v11 = vld [vmem:[%s949_s11 + $0x28] sm:$0xff]   ;;  %v783_v15 = vld [vmem:[%s949_s11 + $0x30] sm:$0xff]  }
  0x30   : > { %717 = vmatprep.subr.bf16.mxu0 %v864_v0  ;;  %s1253_s8 = smov (!%p571_p5, %s1251_s8), 255  ;;  %p218_p8 = scmp.gt.s32.totalorder %s954_s13, 0  ;;  %v408_v10 = vsel %vm391_vm1, %v781_v9, 0  ;;  %v411_v12 = vsel %vm391_vm1, %v782_v11, 0  ;;  %v414_v19 = vsel %vm391_vm1, %v783_v15, 0  ;;  %v784_v25 = vld [vmem:[%s949_s11 + $0x38] sm:$0xff]  }
  0x31   : > { %p583_p9 = scmp.lt.s32.totalorder %s954_s13, 255  ;;  %s1255_s24 = smov (!%p577_p7, %s211_s24), 255  ;;  %v417_v30 = vsel %vm391_vm1, %v784_v25, 0 }
  0x32   : > { %s1257_s13 = smov (!%p218_p8, %s954_s13), 0  ;;  %p226_p12 = scmp.gt.s32.totalorder %s959_s14, 0 }
  0x33   : > { %s1259_s13 = smov (!%p583_p9, %s1257_s13), 255  ;;  %p589_p13 = scmp.lt.s32.totalorder %s959_s14, 255 }
  0x34   : > { %s227_s12 = scalar_select %p226_p12, %s959_s14, 0 }
  0x35   : > { %p234_p0 = scmp.gt.s32.totalorder %s961_s15, 0  ;;  %p595_p1 = scmp.lt.s32.totalorder %s961_s15, 255 }
  0x36   : > { %s1261_s12 = smov (!%p589_p13, %s227_s12), 255  ;;  %p242_p2 = scmp.gt.s32.totalorder %s963_s16, 0 }
  0x37   : > { %718 = vmatpush3.bf16.xpose.msra.mxu0 %v399_v4  ;;  %s1263_s15 = smov (!%p234_p0, %s961_s15), 0  ;;  %p601_p3 = scmp.lt.s32.totalorder %s963_s16, 255 }
  0x38   : > { %719 = vmatprep.subr.bf16.mxu0 %v864_v0  ;;  %s1265_s15 = smov (!%p595_p1, %s1263_s15), 255  ;;  %s612_s5 = sld [smem:[#allocation3 + $0x80]] }
  0x39   : > { %s243_s17 = scalar_select %p242_p2, %s963_s16, 0 }
  0x3a   : > { %s1029_s7 = sld [smem:[#allocation3 + $0x82]]  ;;  %s1038_s14 = sld [smem:[#allocation3 + $0x84]] }
  0x3b   : > { %s1267_s17 = smov (!%p601_p3, %s243_s17), 255  ;;  %s1040_s16 = sld [smem:[#allocation3 + $0x85]] }
  0x3c   : > { %s1042_s18 = sld [smem:[#allocation3 + $0x86]]  ;;  %s1044_s26 = sld [smem:[#allocation3 + $0x87]] }
  0x3d   : > { %p250_p4 = scmp.gt.s32.totalorder %s606_s10, 0  ;;  %p607_p5 = scmp.lt.s32.totalorder %s606_s10, 255 }
  0x3e   : > { %p258_p6 = scmp.gt.s32.totalorder %s612_s5, 0  ;;  %p613_p7 = scmp.lt.s32.totalorder %s612_s5, 255 }
  0x3f   : > { %720 = vmatpush3.bf16.xpose.msra.mxu0 %v402_v6  ;;  %s1269_s10 = smov (!%p250_p4, %s606_s10), 0  ;;  %p266_p8 = scmp.gt.s32.totalorder %s1027_s27, 0 }
  0x40   : > { %721 = vmatprep.subr.bf16.mxu0 %v864_v0  ;;  %s1271_s5 = smov (!%p258_p6, %s612_s5), 0  ;;  %s1273_s10 = smov (!%p607_p5, %s1269_s10), 255 }
  0x41   : > { %s1275_s5 = smov (!%p613_p7, %s1271_s5), 255  ;;  %s254_s2 = scalar_lea.vmem %s1200_s1, %s1273_s10 }
  0x42   : > { %s262_s30 = scalar_lea.vmem %s1200_s1, %s1275_s5  ;;  %p619_p9 = scmp.lt.s32.totalorder %s1027_s27, 255  ;;  %v255_v43 = vld [vmem:[%s254_s2] sm:$0x1] }
  0x43   : > { %s1226_s4 = scalar_lea.vmem %s1200_s1, %s1249_s6  ;;  %s1227_s19 = scalar_lea.vmem %s1200_s1, %s1253_s8  ;;  %v263_v17 = vld [vmem:[%s262_s30] sm:$0x1] }
  0x44   : > { %v199_v13 = vld [vmem:[%s1226_s4] sm:$0x1]  ;;  %s1277_s27 = smov (!%p266_p8, %s1027_s27), 0  ;;  %p274_p12 = scmp.gt.s32.totalorder %s1029_s7, 0 }
  0x45   : > { %v207_v14 = vld [vmem:[%s1227_s19] sm:$0x1]  ;;  %p625_p13 = scmp.lt.s32.totalorder %s1029_s7, 255  ;;  %s1279_s27 = smov (!%p619_p9, %s1277_s27), 255 }
  0x46   : > { %v208_v16 = vadd.f32 %v207_v14, %v199_v13  ;;  %s1281_s7 = smov (!%p274_p12, %s1029_s7), 0  ;;  %s1228_s3 = scalar_lea.vmem %s1200_s1, %s1255_s24 }
  0x47   : > { %722 = vmatpush3.bf16.xpose.msra.mxu0 %v405_v8  ;;  %v215_v18 = vld [vmem:[%s1228_s3] sm:$0x1]  ;;  %s270_s25 = scalar_lea.vmem %s1200_s1, %s1279_s27  ;;  %p282_p0 = scmp.gt.s32.totalorder %s1036_s28, 0 }
  0x48   : > { %723 = vmatprep.subr.bf16.mxu0 %v864_v0  ;;  %v271_v20 = vld [vmem:[%s270_s25] sm:$0x1]  ;;  %s1283_s7 = smov (!%p625_p13, %s1281_s7), 255  ;;  %v216_v22 = vadd.f32 %v215_v18, %v208_v16  ;;  %p631_p1 = scmp.lt.s32.totalorder %s1036_s28, 255 }
  0x49   : > { %v272_v21 = vadd.f32 %v271_v20, %v263_v17  ;;  %s283_s29 = scalar_select %p282_p0, %s1036_s28, 0 }
  0x4a   : > { %s278_s8 = scalar_lea.vmem %s1200_s1, %s1283_s7  ;;  %s1229_s27 = scalar_lea.vmem %s1200_s1, %s1259_s13 }
  0x4b   : > { %v223_v23 = vld [vmem:[%s1229_s27] sm:$0x1]  ;;  %p290_p2 = scmp.gt.s32.totalorder %s1038_s14, 0  ;;  %p637_p3 = scmp.lt.s32.totalorder %s1038_s14, 255 }
  0x4c   : > { %v279_v24 = vld [vmem:[%s278_s8] sm:$0x1]  ;;  %s1285_s29 = smov (!%p631_p1, %s283_s29), 255  ;;  %v224_v27 = vadd.f32 %v223_v23, %v216_v22  ;;  %p298_p4 = scmp.gt.s32.totalorder %s1040_s16, 0 }
  0x4d   : > { %v280_v26 = vadd.f32 %v279_v24, %v272_v21  ;;  %s1287_s14 = smov (!%p290_p2, %s1038_s14), 0  ;;  %s286_s13 = scalar_lea.vmem %s1200_s1, %s1285_s29 }
  0x4e   : > { %s1230_s4 = scalar_lea.vmem %s1200_s1, %s1261_s12  ;;  %v287_v29 = vld [vmem:[%s286_s13] sm:$0x1]  ;;  %s1289_s14 = smov (!%p637_p3, %s1287_s14), 255 }
  0x4f   : > { %724 = vmatpush3.bf16.xpose.msra.mxu0 %v408_v10  ;;  %v231_v28 = vld [vmem:[%s1230_s4] sm:$0x1]  ;;  %v288_v31 = vadd.f32 %v287_v29, %v280_v26  ;;  %s299_s11 = scalar_select %p298_p4, %s1040_s16, 0 }
  0x50   : > { %725 = vmatprep.subr.bf16.mxu0 %v864_v0  ;;  %s294_s0 = scalar_lea.vmem %s1200_s1, %s1289_s14  ;;  %p643_p5 = scmp.lt.s32.totalorder %s1040_s16, 255  ;;  %v232_v32 = vadd.f32 %v231_v28, %v224_v27 }
  0x51   : > { %v295_v33 = vld [vmem:[%s294_s0] sm:$0x1]  ;;  %p306_p6 = scmp.gt.s32.totalorder %s1042_s18, 0  ;;  %p649_p7 = scmp.lt.s32.totalorder %s1042_s18, 255 }
  0x52   : > { %s1231_s25 = scalar_lea.vmem %s1200_s1, %s1265_s15  ;;  %v296_v35 = vadd.f32 %v295_v33, %v288_v31  ;;  %s1291_s11 = smov (!%p643_p5, %s299_s11), 255 }
  0x53   : > { %v239_v34 = vld [vmem:[%s1231_s25] sm:$0x1]  ;;  %s1293_s18 = smov (!%p306_p6, %s1042_s18), 0  ;;  %s302_s16 = scalar_lea.vmem %s1200_s1, %s1291_s11 }
  0x54   : > { %p314_p8 = scmp.gt.s32.totalorder %s1044_s26, 0  ;;  %v240_v36 = vadd.f32 %v239_v34, %v232_v32  ;;  %v303_v37 = vld [vmem:[%s302_s16] sm:$0x1]  ;;  %s1295_s18 = smov (!%p649_p7, %s1293_s18), 255 }
  0x55   : > { %s1232_s8 = scalar_lea.vmem %s1200_s1, %s1267_s17  ;;  %v304_v39 = vadd.f32 %v303_v37, %v296_v35  ;;  %s310_s27 = scalar_lea.vmem %s1200_s1, %s1295_s18 }
  0x56   : > { %v247_v38 = vld [vmem:[%s1232_s8] sm:$0x1]  ;;  %s315_s15 = scalar_select %p314_p8, %s1044_s26, 0 }
  0x57   : > { %726 = vmatpush3.bf16.xpose.msra.mxu0 %v411_v12  ;;  %p655_p9 = scmp.lt.s32.totalorder %s1044_s26, 255  ;;  %v311_v40 = vld [vmem:[%s310_s27] sm:$0x1]  ;;  %v248_v41 = vadd.f32 %v247_v38, %v240_v36  ;;  %p189_p12 = scmp.lt.s32.totalorder %s916_s23, 1 }
  0x58   : > { %727 = vmatprep.subr.bf16.mxu0 %v864_v0  ;;  %v312_v42 = vadd.f32 %v311_v40, %v304_v39  ;;  %s180_s26 = sand.u32 1, %s853_s21   ;;  %s1233_s4 = sld [smem:[#allocation16_spill]] }
  0x59   : > { %s1297_s15 = smov (!%p655_p9, %s315_s15), 255  ;;  %v256_v45 = vadd.f32 %v255_v43, %v248_v41  ;;  %s562_s10 = sshll.u32 %s180_s26, 1 }
  0x5a   : > { %s318_s9 = scalar_lea.vmem %s1200_s1, %s1297_s15  ;;  %s671_s3 = sshll.u32 %s916_s23, 5 }
  0x5b   : > { %v319_v44 = vld [vmem:[%s318_s9] sm:$0x1]  ;;  %s190_s18 = scalar_select %p189_p12, %s916_s23, 1 }
  0x5c   : > { %v320_v46 = vadd.f32 %v319_v44, %v312_v42  ;;  %s182_s0 = scalar_lea.vmem [#allocation4], %s562_s10  ;;  %s1235_s29 = sld [smem:[#allocation17_spill]] }
  0x5d   : > { %s474_s12 = sshll.u32 %s182_s0, 4  ;;  %s461_s16 = scalar_lea.sflag [#allocation5], %s180_s26  ;;  %s1159_s12 = int_to_ptr.vmem [resolvable:$true] %s474_s12 }
  0x5e   : > { %v322_v47 = vrot.slane %v320_v46, 7  ;;  %s191_s11 = scalar_lea.vmem %s1233_s4, %s190_s18  ;;  %s797_s23 = scalar_lea.vmem %s1159_s12, 32 }
  0x5f   : > { %728 = vmatpush3.bf16.xpose.msra.mxu0 %v414_v19  ;;  %v660_v51 = vld [vmem:[%s191_s11] ss:$0 sm:$0xff]  ;;  %p798_p13 = scmp.ne.s32.totalorder %s1159_s12, %s797_s23  ;;  %s866_s30 = smov [#allocation4]  }
  0x60   : > { %729 = vmatprep.subr.bf16.mxu0 %v864_v0  ;;  %v325_v48 = vsel %vm324_vm2, %v256_v45, %v322_v47  ;;  %s801_s6 = sshll.u32 %s866_s30, 4  ;;  %s802_s6 = int_to_ptr.vmem [resolvable:$false] %s801_s6 }
  0x61   : > { %v326_v49 = vmul.f32 0.125, %v325_v48  ;;  %p799_p0 = pnand %p798_p13, %p933_p10  ;;  %s803_s8 = scalar_lea.vmem %s802_s6, 64 }
  0x62   : > { %s1157_s14 = scalar_lea.hbm %s1235_s29, %s671_s3  ;;  %p804_p2 = scmp.lt.s32.totalorder %s1159_s12, %s802_s6 }
  0x63   : > { %v327_v50 = vpack.c.bf16 %v326_v49, %v326_v49  ;;  %p800_p1 = pneg %p799_p0  ;;  %p805_p3 = scmp.lt.s32.totalorder %s803_s8, %s797_s23 }
  0x65   : > { %p806_p4 = por %p805_p3, %p804_p2 }
  0x67   : > { %730 = vmatpush3.bf16.xpose.msra.mxu0 %v417_v30  ;;  %p807_p5 = pnand %p806_p4, %p800_p1 }
  0x6e   : > { %732 = vmatmul.mubr.msk.bf16.vlgmr.msra.gmra.mrb[0].mxu0 %vm391_vm1, %v327_v50 }
 0x141   : > { %v453_v52 = vpop.f32.mrb[0].mxu0 }
 0x142   : > { %v454_v53 = vadd.f32 %v660_v51, %v453_v52  ;;  %v733_v54 = vpop.f32.mrb[1].mxu0 }
 0x143   : > { %v456_v55 = vpop.f32.mrb[2].mxu0 }
 0x144   : > { %459 = vst [vmem:[%s182_s0] sm:$0x3] %v454_v53  ;;  %v734_v56 = vpop.f32.mrb[3].mxu0 }
 0x145   : > { %810 = shalt.err (!%p807_p5)
}
 0x146   : > { %s811_s15 = scalar_lea.hbm %s1157_s14, 32  ;;  %s815_s27 = scalar_lea.hbm %s1235_s29, 64 }
 0x147   : > { %p812_p6 = scmp.ne.s32.totalorder %s1157_s14, %s811_s15  ;;  %p816_p9 = scmp.lt.u32.totalorder %s1157_s14, %s1235_s29 }
 0x148   : > { %p817_p12 = scmp.lt.u32.totalorder %s815_s27, %s811_s15  ;;  %p819_p0 = scmp.lt.u32.totalorder %s811_s15, %s1157_s14 }
 0x149   : > { %p813_p7 = pnand %p812_p6, %p933_p10 }
 0x14a   : > { %p818_p13 = por %p817_p12, %p816_p9 }
 0x14b   : > { %p814_p8 = pneg %p813_p7 }
 0x14c   : > { %p820_p1 = por %p819_p0, %p818_p13 }
 0x14e   : > { %p821_p2 = pnand %p820_p1, %p814_p8 }
 0x150   : > { %824 = shalt.err (!%p821_p2)
}
 0x151   : > { %735 = dma.vmem_to_hbm [thread:$0]  (%p933_p10), %s1159_s12, 32, %s1157_s14, %s461_s16  }
 0x152 PF: > { %s1236_s17 = sld [smem:[#allocation10_spill]]  ;;  %s1237_s13 = sld [smem:[#allocation8_spill]] }
 0x158   : > { %p741_p3 = scmp.ge.s32.totalorder %s1236_s17, 2  ;;  %s486_s26 = sand.u32 1, %s1237_s13  }
 0x159   : > { %s487_s18 = scalar_lea.sflag [#allocation5], %s486_s26 }
 0x15a   : > { %p738_p4 = pnand %p741_p3, %p937_p11 }
 0x15c   : > { %844 = dma.done.wait (!%p738_p4), %s487_s18, 32  }
 0x15d   : > { %846 = vsyncadd (!%p738_p4), %s487_s18, 4294967264  ;;  %s1239_s22 = sld [smem:[#allocation11_spill]]  ;;  %s1240_s10 = sld [smem:[#allocation9_spill]] }
 0x15e   : > { %s1241_s0 = sld [smem:[#allocation12_spill]]  ;;  %s1242_s20 = smov %s853_s21 }
 0x163   : > { %p20_p5 = scmp.ge.s32.totalorder %s1239_s22, 4   ;;  %s1243_s21 = smov %s1240_s10 }
 0x165   :  { %22 = sbr.rel (!%p20_p5) target bundleno = 19 (0x13), region = 86 }
 0x16c   :  { %492 = vsyncpa [#allocation5], 1 }
 0x16d   :  { %494 = vsyncpa [#allocation5 + $0x1], 1 }

</bundles_post_ra>
